<compile_context>
chip_gen: v7x
topology: tpu7x:2x2x1
jax: 0.10.0
libtpu: 0.0.40
codegen_flags: <defaults>
</compile_context>

<pallas_src>
import functools

import jax
import jax.numpy as jnp
from jax.experimental import pallas as pl
from jax.experimental.pallas import tpu as pltpu

_BN_EPS = 1e-5


def _round_up(x, m):
    return (x + m - 1) // m * m


# ---------------------------------------------------------------------------
# Fused linear kernel:  o = [affine]( [relu]( x @ w + b ) )
# x tile: (bm, K), w: (K, N) resident, b/scale/shift: (1, N) resident.
# ---------------------------------------------------------------------------
def _fused_linear_kernel(x_ref, w_ref, b_ref, s_ref, t_ref, o_ref, *, relu, affine):
    y = jnp.dot(x_ref[...], w_ref[...], preferred_element_type=jnp.float32)
    y = y + b_ref[...]
    if relu:
        y = jnp.maximum(y, 0.0)
    if affine:
        y = y * s_ref[...] + t_ref[...]
    o_ref[...] = y.astype(o_ref.dtype)


def fused_linear(x2, w_t, b, scale, shift, *, relu, affine, block_m=512):
    """x2: (M, K) f32, w_t: (K, N), b/scale/shift: (N,). Returns (M, N) f32."""
    M, K = x2.shape
    N = w_t.shape[1]

    # Row tile: multiple of 8 (sublane rule), as large as the problem allows.
    bm = min(block_m, _round_up(max(M, 1), 8))
    m_pad = _round_up(M, bm)
    if m_pad != M:
        x2 = jnp.pad(x2, ((0, m_pad - M), (0, 0)))

    b2 = b.reshape(1, N).astype(jnp.float32)
    s2 = scale.reshape(1, N).astype(jnp.float32)
    t2 = shift.reshape(1, N).astype(jnp.float32)

    kernel = functools.partial(_fused_linear_kernel, relu=relu, affine=affine)

    out = pl.pallas_call(
        kernel,
        out_shape=jax.ShapeDtypeStruct((m_pad, N), jnp.float32),
        grid=(m_pad // bm,),
        in_specs=[
            pl.BlockSpec((bm, K), lambda i: (i, 0)),   # activations: tiled rows
            pl.BlockSpec((K, N), lambda i: (0, 0)),    # weights: resident
            pl.BlockSpec((1, N), lambda i: (0, 0)),    # bias
            pl.BlockSpec((1, N), lambda i: (0, 0)),    # BN scale
            pl.BlockSpec((1, N), lambda i: (0, 0)),    # BN shift
        ],
        out_specs=pl.BlockSpec((bm, N), lambda i: (i, 0)),
        compiler_params=pltpu.CompilerParams(
            dimension_semantics=("parallel",),
        ),
    )(x2.astype(jnp.float32), w_t.astype(jnp.float32), b2, s2, t2)

    return out[:M]


# ---------------------------------------------------------------------------
# Statistics pooling kernel: per-batch mean and unbiased variance over time.
# ---------------------------------------------------------------------------
def _stat_pool_kernel(x_ref, mean_ref, var_ref):
    x = x_ref[0].astype(jnp.float32)                         # (T, D)
    t = x.shape[0]
    mean = jnp.sum(x, axis=0, keepdims=True) / jnp.float32(t)
    diff = x - mean
    var = jnp.sum(diff * diff, axis=0, keepdims=True) / jnp.float32(t - 1)
    mean_ref[...] = mean
    var_ref[...] = var


def stat_pool(x):
    """x: (B, T, D) -> (mean (B, D), unbiased var (B, D)). Matches torch.mean/var."""
    B, T, D = x.shape
    mean, var = pl.pallas_call(
        _stat_pool_kernel,
        out_shape=(
            jax.ShapeDtypeStruct((B, D), jnp.float32),
            jax.ShapeDtypeStruct((B, D), jnp.float32),
        ),
        grid=(B,),
        in_specs=[pl.BlockSpec((1, T, D), lambda b: (b, 0, 0))],
        out_specs=(
            pl.BlockSpec((1, D), lambda b: (b, 0)),
            pl.BlockSpec((1, D), lambda b: (b, 0)),
        ),
        compiler_params=pltpu.CompilerParams(dimension_semantics=("parallel",)),
    )(x.astype(jnp.float32))
    return mean, var


# ---------------------------------------------------------------------------
# Model plumbing (plain JAX: unfold / reshape / param handling).
# ---------------------------------------------------------------------------
def unfold_context(x, context_size, dilation):
    """Equivalent of F.unfold((C, D), stride=(1, D), dilation=(dil, 1)) + transpose."""
    B, T, D = x.shape
    new_t = T - (context_size - 1) * dilation
    frames = [x[:, i * dilation : i * dilation + new_t, :] for i in range(context_size)]
    return jnp.concatenate(frames, axis=-1)                  # (B, new_t, C*D)


def tdnn_layer(x, p, context_size, dilation):
    u = unfold_context(x, context_size, dilation)
    B, new_t, K = u.shape
    # Fold eval-mode BatchNorm1d into a per-channel affine epilogue (rsqrt on EUP).
    inv_std = jax.lax.rsqrt(p["bn_var"] + _BN_EPS)
    scale = p["bn_gamma"] * inv_std
    shift = p["bn_beta"] - p["bn_mean"] * scale
    y = fused_linear(u.reshape(B * new_t, K), p["w_t"], p["b"], scale, shift,
                     relu=True, affine=True)
    return y.reshape(B, new_t, -1)


def _plain_linear(z, lp):
    n = lp["w_t"].shape[1]
    ones = jnp.ones((n,), jnp.float32)
    zeros = jnp.zeros((n,), jnp.float32)
    return fused_linear(z, lp["w_t"], lp["b"], ones, zeros, relu=False, affine=False)


def x_vector_forward(x, params):
    h = x.astype(jnp.float32)
    for p, (c, dil) in zip(params["tdnn"], params["tdnn_specs"]):
        h = tdnn_layer(h, p, c, dil)
    mean, var = stat_pool(h)
    stat = jnp.concatenate([mean, var], axis=-1)             # (B, 512)
    x_vec = _plain_linear(stat, params["seg6"])
    seg7 = _plain_linear(x_vec, params["seg7"])
    logits = _plain_linear(seg7, params["out"])
    return x_vec, seg7, logits


# ---------------------------------------------------------------------------
# Parameter construction (deterministic).
# ---------------------------------------------------------------------------
def _linear_params(key, fan_in, fan_out):
    kw, kb = jax.random.split(key)
    bound = 1.0 / (fan_in ** 0.5)
    return {
        "w_t": jax.random.uniform(kw, (fan_in, fan_out), jnp.float32, -bound, bound),
        "b": jax.random.uniform(kb, (fan_out,), jnp.float32, -bound, bound),
    }


def _bn_params(key, n):
    k1, k2, k3, k4 = jax.random.split(key, 4)
    return {
        "bn_gamma": 1.0 + 0.1 * jax.random.normal(k1, (n,), jnp.float32),
        "bn_beta": 0.1 * jax.random.normal(k2, (n,), jnp.float32),
        "bn_mean": 0.1 * jax.random.normal(k3, (n,), jnp.float32),
        "bn_var": jnp.abs(jax.random.normal(k4, (n,), jnp.float32)) + 0.5,
    }


def init_x_vector_params(key, input_dim, emb_size, n_class):
    tdnn_defs = [(input_dim, 256, 5, 1), (256, 256, 3, 1), (256, 256, 2, 2),
                 (256, 256, 1, 1), (256, 256, 1, 3)]
    keys = jax.random.split(key, len(tdnn_defs) + 3)
    tdnn = []
    for k, (din, dout, c, dil) in zip(keys[: len(tdnn_defs)], tdnn_defs):
        k1, k2 = jax.random.split(k)
        p = _linear_params(k1, din * c, dout)
        p.update(_bn_params(k2, dout))
        tdnn.append(p)
    return {
        "tdnn": tdnn,
        "tdnn_specs": [(c, dil) for (_, _, c, dil) in tdnn_defs],
        "seg6": _linear_params(keys[-3], 256 * 2, emb_size),
        "seg7": _linear_params(keys[-2], emb_size, emb_size),
        "out": _linear_params(keys[-1], emb_size, n_class),
    }


# ---------------------------------------------------------------------------
# Pure-JAX reference (same math, no Pallas) for verification.
# ---------------------------------------------------------------------------
def _mm(a, b):
    return jnp.dot(a, b, precision=jax.lax.Precision.HIGHEST)


def ref_forward(x, params):
    h = x.astype(jnp.float32)
    for p, (c, dil) in zip(params["tdnn"], params["tdnn_specs"]):
        u = unfold_context(h, c, dil)
        y = _mm(u, p["w_t"]) + p["b"]
        y = jnp.maximum(y, 0.0)
        inv = jax.lax.rsqrt(p["bn_var"] + _BN_EPS)
        h = (y - p["bn_mean"]) * inv * p["bn_gamma"] + p["bn_beta"]
    mean = jnp.mean(h, axis=1)
    var = jnp.var(h, axis=1, ddof=1)
    stat = jnp.concatenate([mean, var], axis=-1)
    x_vec = _mm(stat, params["seg6"]["w_t"]) + params["seg6"]["b"]
    seg7 = _mm(x_vec, params["seg7"]["w_t"]) + params["seg7"]["b"]
    logits = _mm(seg7, params["out"]["w_t"]) + params["out"]["b"]
    return x_vec, seg7, logits


if __name__ == "__main__":
    key = jax.random.PRNGKey(0)
    kx, kp = jax.random.split(key)

    B, T, input_dim = 2, 24, 23          # seq long enough for all TDNN contexts
    emb_size, n_class = 128, 2

    x = jax.random.normal(kx, (B, T, input_dim), dtype=jnp.float32)
    params = init_x_vector_params(kp, input_dim, emb_size, n_class)

    x_vec, seg7, logits = x_vector_forward(x, params)
    jax.block_until_ready((x_vec, seg7, logits))

    rx, r7, rl = ref_forward(x, params)
    assert x_vec.shape == (B, emb_size)
    assert seg7.shape == (B, emb_size)
    assert logits.shape == (B, n_class)
    assert jnp.allclose(x_vec, rx, atol=2e-3, rtol=2e-3), "x_vec mismatch"
    assert jnp.allclose(seg7, r7, atol=2e-3, rtol=2e-3), "segment7 mismatch"
    assert jnp.allclose(logits, rl, atol=2e-3, rtol=2e-3), "output mismatch"

    print("KERNEL_OK")
</pallas_src>

<mosaic_0001>
module attributes {stable_mosaic.version = 11 : i64} {
  func.func @_fused_linear_kernel(%arg0: i32, %arg1: memref<40x115xf32, #tpu.memory_space<vmem>>, %arg2: memref<115x256xf32, #tpu.memory_space<vmem>>, %arg3: memref<1x256xf32, #tpu.memory_space<vmem>>, %arg4: memref<1x256xf32, #tpu.memory_space<vmem>>, %arg5: memref<1x256xf32, #tpu.memory_space<vmem>>, %arg6: memref<40x256xf32, #tpu.memory_space<vmem>>) attributes {dimension_semantics = [#tpu.dimension_semantics<parallel>], iteration_bounds = array<i64: 1>, scalar_prefetch = 0 : i64, scratch_operands = 0 : i64, tpu.core_type = #tpu.core_type<tc>, window_params = [{transform_indices = @transform_0, window_bounds = array<i64: 40, 115>}, {pipeline_mode = #tpu.pipeline_mode<synchronous>, transform_indices = @transform_1, window_bounds = array<i64: 115, 256>}, {pipeline_mode = #tpu.pipeline_mode<synchronous>, transform_indices = @transform_2, window_bounds = array<i64: 1, 256>}, {pipeline_mode = #tpu.pipeline_mode<synchronous>, transform_indices = @transform_3, window_bounds = array<i64: 1, 256>}, {pipeline_mode = #tpu.pipeline_mode<synchronous>, transform_indices = @transform_4, window_bounds = array<i64: 1, 256>}, {transform_indices = @transform_5, window_bounds = array<i64: 40, 256>}]} {
    %c0 = arith.constant 0 : index
    %c0_0 = arith.constant 0 : index
    %0 = vector.load %arg1[%c0, %c0_0] : memref<40x115xf32, #tpu.memory_space<vmem>>, vector<40x115xf32>
    %c0_1 = arith.constant 0 : index
    %c0_2 = arith.constant 0 : index
    %1 = vector.load %arg2[%c0_1, %c0_2] : memref<115x256xf32, #tpu.memory_space<vmem>>, vector<115x256xf32>
    %cst = arith.constant dense<0.000000e+00> : vector<40x256xf32>
    %2 = tpu.matmul %0, %1, %cst {dimension_numbers = #tpu.dot_dimension_numbers<[1], [0], [0], [1], [0, 0, 1, 1], [], []>} : vector<40x115xf32>, vector<115x256xf32>, vector<40x256xf32> -> vector<40x256xf32>
    %c0_3 = arith.constant 0 : index
    %c0_4 = arith.constant 0 : index
    %3 = vector.load %arg3[%c0_3, %c0_4] : memref<1x256xf32, #tpu.memory_space<vmem>>, vector<1x256xf32>
    %4 = vector.broadcast %3 : vector<1x256xf32> to vector<40x256xf32>
    %5 = arith.addf %2, %4 : vector<40x256xf32>
    %cst_5 = arith.constant 0.000000e+00 : f32
    %6 = vector.broadcast %cst_5 : f32 to vector<40x256xf32>
    %7 = arith.maximumf %5, %6 : vector<40x256xf32>
    %c0_6 = arith.constant 0 : index
    %c0_7 = arith.constant 0 : index
    %8 = vector.load %arg4[%c0_6, %c0_7] : memref<1x256xf32, #tpu.memory_space<vmem>>, vector<1x256xf32>
    %9 = vector.broadcast %8 : vector<1x256xf32> to vector<40x256xf32>
    %10 = arith.mulf %7, %9 : vector<40x256xf32>
    %c0_8 = arith.constant 0 : index
    %c0_9 = arith.constant 0 : index
    %11 = vector.load %arg5[%c0_8, %c0_9] : memref<1x256xf32, #tpu.memory_space<vmem>>, vector<1x256xf32>
    %12 = vector.broadcast %11 : vector<1x256xf32> to vector<40x256xf32>
    %13 = arith.addf %10, %12 : vector<40x256xf32>
    %c0_10 = arith.constant 0 : index
    %c0_11 = arith.constant 0 : index
    %14 = vector.load %arg6[%c0_10, %c0_11] : memref<40x256xf32, #tpu.memory_space<vmem>>, vector<40x256xf32>
    tpu.vector_store %arg6[%c0_10, %c0_11], %13 {strides = array<i32>} : memref<40x256xf32, #tpu.memory_space<vmem>>, vector<40x256xf32>,
    return
  }
  func.func @transform_0(%arg0: i32) -> (i32, i32) {
    %c0_i32 = arith.constant 0 : i32
    %c0_i32_0 = arith.constant 0 : i32
    return %arg0, %c0_i32 : i32, i32
  }
  func.func @transform_1(%arg0: i32) -> (i32, i32) {
    %c0_i32 = arith.constant 0 : i32
    %c0_i32_0 = arith.constant 0 : i32
    %c0_i32_1 = arith.constant 0 : i32
    return %c0_i32, %c0_i32_0 : i32, i32
  }
  func.func @transform_2(%arg0: i32) -> (i32, i32) {
    %c0_i32 = arith.constant 0 : i32
    %c0_i32_0 = arith.constant 0 : i32
    %c0_i32_1 = arith.constant 0 : i32
    return %c0_i32, %c0_i32_0 : i32, i32
  }
  func.func @transform_3(%arg0: i32) -> (i32, i32) {
    %c0_i32 = arith.constant 0 : i32
    %c0_i32_0 = arith.constant 0 : i32
    %c0_i32_1 = arith.constant 0 : i32
    return %c0_i32, %c0_i32_0 : i32, i32
  }
  func.func @transform_4(%arg0: i32) -> (i32, i32) {
    %c0_i32 = arith.constant 0 : i32
    %c0_i32_0 = arith.constant 0 : i32
    %c0_i32_1 = arith.constant 0 : i32
    return %c0_i32, %c0_i32_0 : i32, i32
  }
  func.func @transform_5(%arg0: i32) -> (i32, i32) {
    %c0_i32 = arith.constant 0 : i32
    %c0_i32_0 = arith.constant 0 : i32
    return %arg0, %c0_i32 : i32, i32
  }
}

</mosaic_0001>

<bundles_post_ra>
// kernel: tpu_custom_call.1
= control target key start
LH: loop header
LB: loop body
LE: loop exit
PB: predicated region body
PF: predicated region fallthrough
CT: control target
= control target key end

     0   :  { %10 = vsyncpa [#allocation3], 0  ;;  %s521_s0 = inlined_call_operand.hbm [shape: f32[40,115], index: 0, kind: input, shape index: {}]   ;;  %s522_s1 = inlined_call_operand.hbm [shape: f32[115,256], index: 1, kind: input, shape index: {}]   ;;  %s523_s2 = inlined_call_operand.vmem [shape: f32[1,256], index: 2, kind: input, shape index: {}]   ;;  %s524_s3 = inlined_call_operand.vmem [shape: f32[1,256], index: 3, kind: input, shape index: {}]   ;;  %s525_s4 = inlined_call_operand.vmem [shape: f32[1,256], index: 4, kind: input, shape index: {}]   ;;  %s526_s5 = inlined_call_operand.hbm [shape: f32[40,256], index: 5, kind: output, shape index: {}]  }
   0x1   :  { %11 = vsyncpa [#allocation6], 0 }
   0x2   :  { %12 = vsyncpa [#allocation4], 0  ;;  %s427_s18 = smov [#allocation2]   ;;  %s355_s22 = scalar_lea.hbm %s521_s0, 640 }
   0x3   :  { %s18_s19 = sshll.u32 %s427_s18, 4  ;;  %p356_p0 = scmp.ne.s32.totalorder %s521_s0, %s355_s22  ;;  %s19_s19 = int_to_ptr.vmem [resolvable:$true] %s18_s19 }
   0x4   :  { %p359_p1 = scmp.lt.u32.totalorder %s355_s22, %s521_s0 }
   0x6   :  { %p361_p2 = pnand %p359_p1, %p356_p0 }
   0x8   :  { %364 = shalt.err (!%p361_p2)
}
   0x9   :  { %s365_s27 = scalar_lea.vmem %s19_s19, 640  ;;  %p370_p4 = scmp.lt.s32.totalorder %s19_s19, %s19_s19 }
   0xa   :  { %p366_p3 = scmp.ne.s32.totalorder %s19_s19, %s365_s27  ;;  %p371_p5 = scmp.lt.s32.totalorder %s365_s27, %s365_s27 }
   0xc   :  { %p372_p6 = por %p371_p5, %p370_p4 }
   0xe   :  { %p373_p7 = pnand %p372_p6, %p366_p3 }
  0x10   :  { %376 = shalt.err (!%p373_p7)
}
  0x11   :  { %s428_s28 = smov 128   ;;  %s429_s29 = smov 8  }
  0x12   :  { %24 = dma.hbm_to_vmem [thread:$0]  %s521_s0, 640, %s19_s19, [#allocation3], %s428_s28, %s428_s28, %s429_s29  }
  0x13   :  { %s430_s7 = smov [#allocation5]   ;;  %s377_s11 = scalar_lea.hbm %s522_s1, 3840 }
  0x14   :  { %s30_s8 = sshll.u32 %s430_s7, 4  ;;  %p378_p8 = scmp.ne.s32.totalorder %s522_s1, %s377_s11  ;;  %s31_s8 = int_to_ptr.vmem [resolvable:$true] %s30_s8 }
  0x15   :  { %p381_p9 = scmp.lt.u32.totalorder %s377_s11, %s522_s1 }
  0x17   :  { %p383_p10 = pnand %p381_p9, %p378_p8 }
  0x19   :  { %386 = shalt.err (!%p383_p10)
}
  0x1a   :  { %s387_s16 = scalar_lea.vmem %s31_s8, 3840  ;;  %p392_p12 = scmp.lt.s32.totalorder %s31_s8, %s31_s8 }
  0x1b   :  { %p388_p11 = scmp.ne.s32.totalorder %s31_s8, %s387_s16  ;;  %p393_p13 = scmp.lt.s32.totalorder %s387_s16, %s387_s16 }
  0x1d   :  { %p394_p0 = por %p393_p13, %p392_p12 }
  0x1f   :  { %p395_p1 = pnand %p394_p0, %p388_p11 }
  0x21   :  { %398 = shalt.err (!%p395_p1)
}
  0x22   :  { %s431_s0 = smov 256   ;;  %s432_s17 = smov 16  }
  0x23   :  { %36 = dma.hbm_to_vmem [thread:$0]  %s522_s1, 3840, %s31_s8, [#allocation6], %s431_s0, %s431_s0, %s432_s17  }
  0x24   :  { %421 = dma.done.wait [#allocation3], 640  }
  0x25   :  { %422 = vsyncadd [#allocation3], 4294966656 }
  0x26   :  { %423 = dma.done.wait [#allocation6], 3840  }
  0x27   :  { %424 = vsyncadd [#allocation6], 4294963456  ;;  %v433_v0 = vmov 0.0   ;;  %v55_v1 = vld [vmem:[#allocation5 + $0x8] sm:$0xff]  ;;  %v57_v2 = vld [vmem:[#allocation5 + $0x18] sm:$0xff]  ;;  %vm112_vm0 = vcmask 1042432   ;;  %v86_v50 = vlaneseq }
  0x28   :  { %183 = vmatprep.mubr.f32.mxu0 %v433_v0  ;;  %201 = vmatprep.mubr.f32.mxu1 %v433_v0  ;;  %v54_v3 = vld [vmem:[#allocation5] sm:$0xff]  ;;  %v303_v4 = vpack.c.bf16 %v57_v2, %v55_v1  ;;  %v56_v5 = vld [vmem:[#allocation5 + $0x10] sm:$0xff]  ;;  %v59_v6 = vld [vmem:[#allocation5 + $0x28] sm:$0xff]  ;;  %vm96_vm1 = vcmask 941056  }
  0x29   :  { %v61_v7 = vld [vmem:[#allocation5 + $0x38] sm:$0xff]  ;;  %v305_v8 = vpack.c.bf16 %v56_v5, %v54_v3  ;;  %v58_v10 = vld [vmem:[#allocation5 + $0x20] sm:$0xff]  ;;  %v60_v11 = vld [vmem:[#allocation5 + $0x30] sm:$0xff]  ;;  %v87_v51 = vshrl.u32 %v86_v50, 7 }
  0x2a   :  { %v307_v9 = vpack.c.bf16 %v61_v7, %v59_v6  ;;  %v63_v12 = vld [vmem:[#allocation5 + $0x48] sm:$0xff]  ;;  %304 = vmatprep.subr.bf16.mxu0 %v303_v4  ;;  %331 = vmatprep.subr.bf16.mxu1 %v303_v4  ;;  %v65_v13 = vld [vmem:[#allocation5 + $0x58] sm:$0xff]  ;;  %v309_v14 = vpack.c.bf16 %v60_v11, %v58_v10  ;;  %v62_v16 = vld [vmem:[#allocation5 + $0x40] sm:$0xff] }
  0x2b   :  { %306 = vmatpush1.bf16.msra.mxu0 %v305_v8  ;;  %339 = vmatpush1.bf16.msra.mxu1 %v305_v8  ;;  %v311_v15 = vpack.c.bf16 %v65_v13, %v63_v12  ;;  %v64_v17 = vld [vmem:[#allocation5 + $0x50] sm:$0xff]  ;;  %v67_v18 = vld [vmem:[#allocation5 + $0x68] sm:$0xff]  ;;  %v69_v19 = vld [vmem:[#allocation5 + $0x78] sm:$0xff]  ;;  %v88_v52 = vsub.s32 0, %v87_v51  ;;  %v92_v54 = vsub.s32 1, %v87_v51 }
  0x2c   :  { %308 = vmatprep.subr.bf16.mxu0 %v307_v9  ;;  %332 = vmatprep.subr.bf16.mxu1 %v307_v9  ;;  %v313_v20 = vpack.c.bf16 %v64_v17, %v62_v16  ;;  %v315_v21 = vpack.c.bf16 %v69_v19, %v67_v18  ;;  %v66_v22 = vld [vmem:[#allocation5 + $0x60] sm:$0xff]  ;;  %v68_v23 = vld [vmem:[#allocation5 + $0x70] sm:$0xff]  ;;  %v71_v24 = vld [vmem:[#allocation5 + $0x88] sm:$0xff] }
  0x2d   :  { %v73_v25 = vld [vmem:[#allocation5 + $0x98] sm:$0xff]  ;;  %v317_v26 = vpack.c.bf16 %v68_v23, %v66_v22  ;;  %v70_v28 = vld [vmem:[#allocation5 + $0x80] sm:$0xff]  ;;  %v72_v29 = vld [vmem:[#allocation5 + $0x90] sm:$0xff] }
  0x2e   :  { %v319_v27 = vpack.c.bf16 %v73_v25, %v71_v24  ;;  %v75_v30 = vld [vmem:[#allocation5 + $0xa8] sm:$0xff]  ;;  %v77_v31 = vld [vmem:[#allocation5 + $0xb8] sm:$0xff]  ;;  %v321_v32 = vpack.c.bf16 %v72_v29, %v70_v28  ;;  %v74_v34 = vld [vmem:[#allocation5 + $0xa0] sm:$0xff] }
  0x2f   :  { %310 = vmatpush1.bf16.msra.mxu0 %v309_v14  ;;  %340 = vmatpush1.bf16.msra.mxu1 %v309_v14  ;;  %v323_v33 = vpack.c.bf16 %v77_v31, %v75_v30  ;;  %v76_v35 = vld [vmem:[#allocation5 + $0xb0] sm:$0xff]  ;;  %v79_v36 = vld [vmem:[#allocation5 + $0xc8] sm:$0xff]  ;;  %v81_v37 = vld [vmem:[#allocation5 + $0xd8] sm:$0xff] }
  0x30   :  { %312 = vmatprep.subr.bf16.mxu0 %v311_v15  ;;  %333 = vmatprep.subr.bf16.mxu1 %v311_v15  ;;  %v325_v38 = vpack.c.bf16 %v76_v35, %v74_v34  ;;  %v327_v39 = vpack.c.bf16 %v81_v37, %v79_v36  ;;  %v78_v40 = vld [vmem:[#allocation5 + $0xc0] sm:$0xff]  ;;  %v80_v41 = vld [vmem:[#allocation5 + $0xd0] sm:$0xff]  ;;  %v83_v43 = vld [vmem:[#allocation5 + $0xe8] sm:$0x7] }
  0x31   :  { %v329_v42 = vpack.c.bf16 %v80_v41, %v78_v40  ;;  %v82_v44 = vld [vmem:[#allocation5 + $0xe0] sm:$0x7]  ;;  %v49_v45 = vld [vmem:[#allocation2] sm:$0xff]  ;;  %v52_v46 = vld [vmem:[#allocation2 + $0x18] sm:$0xff] }
  0x32   :  { %v50_v47 = vld [vmem:[#allocation2 + $0x8] sm:$0xff]  ;;  %v53_v48 = vld [vmem:[#allocation2 + $0x20] sm:$0xff]  ;;  %v51_v49 = vld [vmem:[#allocation2 + $0x10] sm:$0xff] }
  0x33   :  { %314 = vmatpush1.bf16.msra.mxu0 %v313_v20  ;;  %341 = vmatpush1.bf16.msra.mxu1 %v313_v20  ;;  %v84_v53 = vld [vmem:[%s523_s2] sm:$0x3]  ;;  %s434_s2 = smov [#allocation7]  }
  0x34   :  { %316 = vmatprep.subr.bf16.mxu0 %v315_v21  ;;  %334 = vmatprep.subr.bf16.mxu1 %v315_v21  ;;  %v89_v55 = vrot.slane %v84_v53, %v88_v52  ;;  %v224_v56 = vld [vmem:[%s524_s3] sm:$0x3]  ;;  %v93_v57 = vrot.slane %v84_v53, %v92_v54  ;;  %s283_s3 = sshll.u32 %s434_s2, 4  ;;  %s284_s3 = int_to_ptr.vmem [resolvable:$true] %s283_s3 }
  0x35   :  { %v246_v59 = vld [vmem:[%s525_s4] sm:$0x3]  ;;  %v229_v62 = vrot.slane %v224_v56, %v88_v52  ;;  %v233_v3 = vrot.slane %v224_v56, %v92_v54  ;;  %s399_s4 = scalar_lea.vmem %s284_s3, 1280  ;;  %p404_p3 = scmp.lt.s32.totalorder %s284_s3, %s284_s3 }
  0x36   :  { %v251_v6 = vrot.slane %v246_v59, %v88_v52  ;;  %v255_v9 = vrot.slane %v246_v59, %v92_v54  ;;  %p400_p2 = scmp.ne.s32.totalorder %s284_s3, %s399_s4  ;;  %p405_p4 = scmp.lt.s32.totalorder %s399_s4, %s399_s4 }
  0x37   :  { %318 = vmatpush1.bf16.msra.mxu0 %v317_v26  ;;  %342 = vmatpush1.bf16.msra.mxu1 %v317_v26 }
  0x38   :  { %320 = vmatprep.subr.bf16.mxu0 %v319_v27  ;;  %335 = vmatprep.subr.bf16.mxu1 %v319_v27  ;;  %p406_p5 = por %p405_p4, %p404_p3 }
  0x3a   :  { %p407_p6 = pnand %p406_p5, %p400_p2 }
  0x3b   :  { %322 = vmatpush1.bf16.msra.mxu0 %v321_v32  ;;  %343 = vmatpush1.bf16.msra.mxu1 %v321_v32 }
  0x3c   :  { %324 = vmatprep.subr.bf16.mxu0 %v323_v33  ;;  %336 = vmatprep.subr.bf16.mxu1 %v323_v33 }
  0x3f   :  { %326 = vmatpush1.bf16.msra.mxu0 %v325_v38  ;;  %344 = vmatpush1.bf16.msra.mxu1 %v325_v38 }
  0x40   :  { %328 = vmatprep.subr.bf16.mxu0 %v327_v39  ;;  %337 = vmatprep.subr.bf16.mxu1 %v327_v39 }
  0x43   :  { %330 = vmatpush1.bf16.msra.mxu0 %v329_v42  ;;  %345 = vmatpush1.bf16.msra.mxu1 %v329_v42 }
  0x44   :  { %296 = vmatprep.subr.msk.mxu0 %vm112_vm0, %v83_v43  ;;  %338 = vmatprep.subr.msk.mxu1 %vm112_vm0, %v83_v43 }
  0x47   :  { %297 = vmatpush1.msk.msra.mxu0 %vm112_vm0, %v82_v44  ;;  %346 = vmatpush1.msk.msra.mxu1 %vm112_vm0, %v82_v44 }
  0x48   :  { %298 = vmatmul.mubr.msk.f32.vlgmr.msra.gmra.mrb[0].mxu0 %vm96_vm1, %v49_v45  ;;  %301 = vmatmul.mubr.msk.f32.vlgmr.msra.gmra.mrb[0].mxu1 %vm96_vm1, %v52_v46 }
  0x49   :  { %189 = vmatprep.mubr.f32.mxu0 %v433_v0  ;;  %207 = vmatprep.mubr.f32.mxu1 %v433_v0 }
  0x4c   :  { %299 = vmatmul.mubr.msk.f32.gmra.mrb[2].mxu0 %vm96_vm1, %v50_v47  ;;  %302 = vmatmul.mubr.msk.f32.gmra.mrb[2].mxu1 %vm96_vm1, %v53_v48 }
  0x4d   :  { %195 = vmatprep.mubr.f32.mxu0 %v433_v0 }
  0x50   :  { %300 = vmatmul.mubr.msk.f32.gmra.mrb[4].mxu0 %vm96_vm1, %v51_v49 }
 0x11b   :  { %v185_v58 = vpop.f32.mrb[0].mxu0  ;;  %v203_v60 = vpop.f32.mrb[0].mxu1 }
 0x11c   :  { %v186_v61 = vadd.f32 %v185_v58, %v89_v55  ;;  %v187_v63 = vpop.f32.mrb[1].mxu0  ;;  %v204_v0 = vadd.f32 %v203_v60, %v89_v55  ;;  %v205_v1 = vpop.f32.mrb[1].mxu1 }
 0x11d   :  { %v188_v2 = vadd.f32 %v187_v63, %v93_v57  ;;  %v206_v4 = vadd.f32 %v205_v1, %v93_v57 }
 0x11e   :  { %v214_v5 = vmax.f32 %v186_v61, 0.0  ;;  %v220_v7 = vmax.f32 %v204_v0, 0.0 }
 0x11f   :  { %v215_v8 = vmax.f32 %v188_v2, 0.0  ;;  %v191_v10 = vpop.f32.mrb[2].mxu0  ;;  %v221_v11 = vmax.f32 %v206_v4, 0.0  ;;  %v209_v12 = vpop.f32.mrb[2].mxu1 }
 0x120   :  { %v236_v13 = vmul.f32 %v229_v62, %v214_v5  ;;  %v242_v14 = vmul.f32 %v229_v62, %v220_v7  ;;  %v192_v15 = vadd.f32 %v191_v10, %v89_v55  ;;  %v193_v16 = vpop.f32.mrb[3].mxu0  ;;  %v210_v17 = vadd.f32 %v209_v12, %v89_v55  ;;  %v211_v18 = vpop.f32.mrb[3].mxu1 }
 0x121   :  { %v237_v19 = vmul.f32 %v233_v3, %v215_v8  ;;  %v243_v20 = vmul.f32 %v233_v3, %v221_v11  ;;  %v194_v21 = vadd.f32 %v193_v16, %v93_v57  ;;  %v212_v22 = vadd.f32 %v211_v18, %v93_v57 }
 0x122   :  { %v258_v23 = vadd.f32 %v251_v6, %v236_v13  ;;  %v264_v24 = vadd.f32 %v251_v6, %v242_v14  ;;  %v216_v25 = vmax.f32 %v192_v15, 0.0  ;;  %v222_v26 = vmax.f32 %v210_v17, 0.0 }
 0x123   :  { %v259_v27 = vadd.f32 %v255_v9, %v237_v19  ;;  %v265_v28 = vadd.f32 %v255_v9, %v243_v20  ;;  %v217_v29 = vmax.f32 %v194_v21, 0.0  ;;  %v197_v30 = vpop.f32.mrb[4].mxu0  ;;  %v223_v31 = vmax.f32 %v212_v22, 0.0 }
 0x124   :  { %268 = vst [vmem:[#allocation7] sm:$0xff] %v258_v23  ;;  %274 = vst [vmem:[#allocation7 + $0x30] sm:$0xff] %v264_v24  ;;  %v238_v32 = vmul.f32 %v229_v62, %v216_v25  ;;  %v244_v33 = vmul.f32 %v229_v62, %v222_v26  ;;  %v198_v34 = vadd.f32 %v197_v30, %v89_v55  ;;  %v199_v35 = vpop.f32.mrb[5].mxu0 }
 0x125   :  { %269 = vst [vmem:[#allocation7 + $0x8] sm:$0xff] %v259_v27  ;;  %275 = vst [vmem:[#allocation7 + $0x38] sm:$0xff] %v265_v28  ;;  %v239_v36 = vmul.f32 %v233_v3, %v217_v29  ;;  %v245_v37 = vmul.f32 %v233_v3, %v223_v31  ;;  %v200_v38 = vadd.f32 %v199_v35, %v93_v57 }
 0x126   :  { %v260_v39 = vadd.f32 %v251_v6, %v238_v32  ;;  %v266_v40 = vadd.f32 %v251_v6, %v244_v33  ;;  %v218_v41 = vmax.f32 %v198_v34, 0.0 }
 0x127   :  { %v261_v42 = vadd.f32 %v255_v9, %v239_v36  ;;  %v267_v43 = vadd.f32 %v255_v9, %v245_v37  ;;  %v219_v44 = vmax.f32 %v200_v38, 0.0 }
 0x128   :  { %270 = vst [vmem:[#allocation7 + $0x10] sm:$0xff] %v260_v39  ;;  %276 = vst [vmem:[#allocation7 + $0x40] sm:$0xff] %v266_v40  ;;  %v240_v45 = vmul.f32 %v229_v62, %v218_v41 }
 0x129   :  { %271 = vst [vmem:[#allocation7 + $0x18] sm:$0xff] %v261_v42  ;;  %277 = vst [vmem:[#allocation7 + $0x48] sm:$0xff] %v267_v43  ;;  %v241_v46 = vmul.f32 %v233_v3, %v219_v44 }
 0x12a   :  { %v262_v47 = vadd.f32 %v251_v6, %v240_v45 }
 0x12b   :  { %v263_v48 = vadd.f32 %v255_v9, %v241_v46 }
 0x12c   :  { %272 = vst [vmem:[#allocation7 + $0x20] sm:$0xff] %v262_v47 }
 0x12d   :  { %273 = vst [vmem:[#allocation7 + $0x28] sm:$0xff] %v263_v48 }
 0x12e   :  { %410 = shalt.err (!%p407_p6)
}
 0x12f   :  { %s411_s27 = scalar_lea.hbm %s526_s5, 1280 }
 0x130   :  { %p412_p7 = scmp.ne.s32.totalorder %s526_s5, %s411_s27  ;;  %p415_p8 = scmp.lt.u32.totalorder %s411_s27, %s526_s5 }
 0x132   :  { %p417_p9 = pnand %p415_p8, %p412_p7 }
 0x134   :  { %420 = shalt.err (!%p417_p9)
}
 0x135   :  { %289 = dma.vmem_to_hbm [thread:$0]  %s284_s3, 1280, %s526_s5, [#allocation4], %s431_s0, %s431_s0, %s432_s17  }
 0x136   :  { %425 = dma.done.wait [#allocation4], 1280  }
 0x137   :  { %426 = vsyncadd [#allocation4], 4294966016 }
 0x138   :  { %293 = vsyncpa [#allocation3], 1 }
 0x139   :  { %294 = vsyncpa [#allocation6], 1 }
 0x13a   :  { %295 = vsyncpa [#allocation4], 1 }

</bundles_post_ra>
